<compile_context>
chip_gen: v7x
topology: tpu7x:2x2x1
jax: 0.10.0
libtpu: 0.0.40
codegen_flags: <defaults>
</compile_context>

<pallas_src>
import functools

import jax
import jax.numpy as jnp
from jax.experimental import pallas as pl
from jax.experimental.pallas import tpu as pltpu


def _round_up(x, m):
    return -(-x // m) * m


# ---------------------------------------------------------------------------
# Kernel
# ---------------------------------------------------------------------------
def encoder_kernel(x_ref,
                   w1_ref, b1_ref,
                   w2_ref, b2_ref,
                   w3_ref, b3_ref,
                   whv_ref, bhv_ref,
                   out_ref, *, z_dim):
    cdt = w1_ref.dtype  # bf16 compute dtype for MXU operands

    # x arrives in f32; the bf16 cast happens here on the VPU (hides under MXU
    # slack and avoids a separate wrapper-side cast / extra HBM pass).
    h = jnp.dot(x_ref[...].astype(cdt), w1_ref[...],
                preferred_element_type=jnp.float32)
    h = jnp.maximum(h + b1_ref[...], 0.0)

    h = jnp.dot(h.astype(cdt), w2_ref[...], preferred_element_type=jnp.float32)
    h = jnp.maximum(h + b2_ref[...], 0.0)

    h = jnp.dot(h.astype(cdt), w3_ref[...], preferred_element_type=jnp.float32)
    h = jnp.maximum(h + b3_ref[...], 0.0)

    # Fused (mean | logvar | lane-pad) head: one MXU matmul, one lane-dense
    # (tile_b, head_pad) store with head_pad a multiple of 128.
    mv = jnp.dot(h.astype(cdt), whv_ref[...], preferred_element_type=jnp.float32)
    mv = mv + bhv_ref[...]

    col = jax.lax.broadcasted_iota(jnp.int32, mv.shape, 1)
    is_mean = col < z_dim
    # Feed 0 into exp() on the mean/pad lanes so no spurious inf/NaN is formed.
    var = jnp.exp(jnp.where(is_mean, 0.0, mv))
    out_ref[...] = jnp.where(is_mean, mv, var).astype(out_ref.dtype)


# ---------------------------------------------------------------------------
# One-time parameter preparation (hoisted out of the per-call path)
# ---------------------------------------------------------------------------
def prepare_params(params, *, compute_dtype=jnp.bfloat16,
                   hidden_align=128, lane_align=128):
    """Fuse mean/var heads, zero-pad dims to lane/MXU multiples, cast dtypes.

    Padding is exact: padded rows/cols are zero, relu(0) = 0 passes through,
    and the padded head columns are discarded by the wrapper slice.
    """
    def pad2d(a, rows, cols):
        pr, pc = rows - a.shape[0], cols - a.shape[1]
        if pr or pc:
            a = jnp.pad(a, ((0, pr), (0, pc)))
        return a

    n_input = params["w1"].shape[0]
    h1 = params["w1"].shape[1]
    h2 = params["w2"].shape[1]
    h3 = params["w3"].shape[1]
    z_dim = params["wm"].shape[1]

    h1p = _round_up(h1, hidden_align)
    h2p = _round_up(h2, hidden_align)
    h3p = _round_up(h3, hidden_align)
    head_pad = _round_up(max(2 * z_dim, lane_align), lane_align)

    whv = jnp.concatenate([params["wm"], params["wv"]], axis=1)
    bhv = jnp.concatenate([params["bm"], params["bv"]], axis=1)

    return dict(
        w1=pad2d(params["w1"], n_input, h1p).astype(compute_dtype),
        b1=pad2d(params["b1"], 1, h1p).astype(jnp.float32),
        w2=pad2d(params["w2"], h1p, h2p).astype(compute_dtype),
        b2=pad2d(params["b2"], 1, h2p).astype(jnp.float32),
        w3=pad2d(params["w3"], h2p, h3p).astype(compute_dtype),
        b3=pad2d(params["b3"], 1, h3p).astype(jnp.float32),
        whv=pad2d(whv, h3p, head_pad).astype(compute_dtype),
        bhv=pad2d(bhv, 1, head_pad).astype(jnp.float32),
        z_dim=z_dim,
        n_input=n_input,
    )


def _vmem_ceiling_bytes():
    """Chip-aware VMEM ceiling (~85% of physical: ~54 MiB v7x, ~109 MiB v5e/v6e)."""
    try:
        cap = int(pltpu.get_tpu_info().vmem_capacity_bytes)
    except Exception:
        cap = 128 * 2**20
    return int(cap * 0.85)


# ---------------------------------------------------------------------------
# Forward
# ---------------------------------------------------------------------------
def encoder_forward(x, prepped, *, tile_b=1024):
    """x: any shape whose elements fold to (-1, n_input). Returns (mean, var)."""
    n_input = prepped["n_input"]
    z_dim = prepped["z_dim"]
    w1, b1 = prepped["w1"], prepped["b1"]
    w2, b2 = prepped["w2"], prepped["b2"]
    w3, b3 = prepped["w3"], prepped["b3"]
    whv, bhv = prepped["whv"], prepped["bhv"]
    h1p, h2p, h3p = w1.shape[1], w2.shape[1], w3.shape[1]
    head_pad = whv.shape[1]

    x2d = x.reshape(-1, n_input).astype(jnp.float32)
    batch = x2d.shape[0]

    # ---- batch tiling ------------------------------------------------------
    tile_b = max(8, min(_round_up(tile_b, 8), _round_up(batch, 8)))
    # Keep >= 2 grid steps when the batch allows so ("parallel",) shards work
    # across v7x's 2 TensorCores (no cost on single-TC v5e/v6e).
    if _round_up(batch, 8) >= 16:
        tile_b = min(tile_b, _round_up(pl.cdiv(batch, 2), 8))

    ceiling = _vmem_ceiling_bytes()
    weight_bytes = sum(int(a.size) * a.dtype.itemsize
                       for a in (w1, b1, w2, b2, w3, b3, whv, bhv))

    def vmem_estimate(tb):
        io = 2 * (tb * n_input * 4 + tb * head_pad * 4)   # double-buffered x/out
        act = 4 * tb * (h1p + h2p + h3p + head_pad)       # f32 intermediates
        return 2 * weight_bytes + io + act + (4 << 20)    # + headroom

    # Shrink the tile if the estimate would blow the chip's VMEM (v7x: 64 MiB).
    while tile_b > 8 and vmem_estimate(tile_b) > ceiling:
        tile_b = max(8, _round_up(tile_b // 2, 8))

    n_tiles = pl.cdiv(batch, tile_b)
    vmem_limit = int(min(ceiling, max(32 * 2**20, vmem_estimate(tile_b))))

    rows = n_tiles * tile_b
    flops = 2 * rows * (n_input * h1p + h1p * h2p + h2p * h3p + h3p * head_pad)
    bytes_accessed = (batch * n_input * 4 + weight_bytes + batch * head_pad * 4)

    def resident(shape, single_buffer):
        idx = lambda i: (0, 0)
        if single_buffer:
            try:
                # Constant index_map -> the block is never re-fetched; one
                # buffer suffices (halves VMEM held by resident weights).
                return pl.BlockSpec(shape, idx, pipeline_mode=pl.Buffered(1))
            except (TypeError, AttributeError):
                pass
        return pl.BlockSpec(shape, idx)

    def build(single_buffer_weights):
        in_specs = [
            pl.BlockSpec((tile_b, n_input), lambda i: (i, 0)),
            resident((n_input, h1p), single_buffer_weights),
            resident((1, h1p), single_buffer_weights),
            resident((h1p, h2p), single_buffer_weights),
            resident((1, h2p), single_buffer_weights),
            resident((h2p, h3p), single_buffer_weights),
            resident((1, h3p), single_buffer_weights),
            resident((h3p, head_pad), single_buffer_weights),
            resident((1, head_pad), single_buffer_weights),
        ]
        out_specs = pl.BlockSpec((tile_b, head_pad), lambda i: (i, 0))
        return pl.pallas_call(
            functools.partial(encoder_kernel, z_dim=z_dim),
            out_shape=jax.ShapeDtypeStruct((batch, head_pad), jnp.float32),
            grid=(n_tiles,),
            in_specs=in_specs,
            out_specs=out_specs,
            compiler_params=pltpu.CompilerParams(
                dimension_semantics=("parallel",),
                vmem_limit_bytes=vmem_limit),
            cost_estimate=pl.CostEstimate(
                flops=flops,
                transcendentals=rows * head_pad,
                bytes_accessed=bytes_accessed),
        )

    args = (x2d, w1, b1, w2, b2, w3, b3, whv, bhv)
    try:
        out = build(True)(*args)
    except Exception:
        # Fallback for JAX versions without Buffered(1) support on residents.
        out = build(False)(*args)

    mean = out[:, :z_dim]
    var = out[:, z_dim:2 * z_dim]
    return mean, var


# ---------------------------------------------------------------------------
# Params / reference
# ---------------------------------------------------------------------------
def init_params(key, n_input, h1, h2, h3, z_dim):
    """PyTorch-Linear-like init; weights stored as (in, out) for x @ W + b."""
    def linear(k, fan_in, fan_out):
        kw, kb = jax.random.split(k)
        bound = 1.0 / jnp.sqrt(jnp.float32(fan_in))
        w = jax.random.uniform(kw, (fan_in, fan_out), jnp.float32, -bound, bound)
        b = jax.random.uniform(kb, (1, fan_out), jnp.float32, -bound, bound)
        return w, b

    k1, k2, k3, k4, k5 = jax.random.split(key, 5)
    w1, b1 = linear(k1, n_input, h1)
    w2, b2 = linear(k2, h1, h2)
    w3, b3 = linear(k3, h2, h3)
    wm, bm = linear(k4, h3, z_dim)
    wv, bv = linear(k5, h3, z_dim)
    return dict(w1=w1, b1=b1, w2=w2, b2=b2, w3=w3, b3=b3,
                wm=wm, bm=bm, wv=wv, bv=bv)


def reference_forward(x, params, n_input, compute_dtype=jnp.bfloat16):
    """Pure-JAX reference mirroring the kernel's bf16-matmul / f32-epilogue."""
    x2d = x.reshape(-1, n_input)

    def dense(a, w, b):
        return jnp.dot(a.astype(compute_dtype), w.astype(compute_dtype),
                       preferred_element_type=jnp.float32) + b

    h = jnp.maximum(dense(x2d, params["w1"], params["b1"]), 0.0)
    h = jnp.maximum(dense(h, params["w2"], params["b2"]), 0.0)
    h = jnp.maximum(dense(h, params["w3"], params["b3"]), 0.0)
    mean = dense(h, params["wm"], params["bm"])
    var = jnp.exp(dense(h, params["wv"], params["bv"]))
    return mean, var


if __name__ == "__main__":
    # Small shapes: x of shape (2, 4, 16) with n_input=16 -> effective batch 8.
    n_input, h1, h2, h3, z_dim = 16, 32, 32, 32, 8

    key = jax.random.PRNGKey(0)
    kx, kp = jax.random.split(key)
    x = jax.random.normal(kx, (2, 4, 16), dtype=jnp.float32)
    params = init_params(kp, n_input, h1, h2, h3, z_dim)

    prepped = prepare_params(params)          # one-time prep (hoisted)
    mean, var = encoder_forward(x, prepped)
    jax.block_until_ready((mean, var))

    # Sanity check against a pure-JAX reference with matching compute dtype.
    mean_ref, var_ref = reference_forward(x, params, n_input)
    assert mean.shape == (8, z_dim) and var.shape == (8, z_dim)
    assert jnp.allclose(mean, mean_ref, atol=2e-3, rtol=2e-3)
    assert jnp.allclose(var, var_ref, atol=2e-3, rtol=2e-3)
    assert bool(jnp.all(var > 0))

    print("KERNEL_OK")
</pallas_src>

<mosaic_0001>
module attributes {stable_mosaic.version = 11 : i64} {
  func.func @encoder_kernel(%arg0: i32, %arg1: memref<8x16xf32, #tpu.memory_space<vmem>>, %arg2: memref<16x128xbf16, #tpu.memory_space<vmem>>, %arg3: memref<1x128xf32, #tpu.memory_space<vmem>>, %arg4: memref<128x128xbf16, #tpu.memory_space<vmem>>, %arg5: memref<1x128xf32, #tpu.memory_space<vmem>>, %arg6: memref<128x128xbf16, #tpu.memory_space<vmem>>, %arg7: memref<1x128xf32, #tpu.memory_space<vmem>>, %arg8: memref<128x128xbf16, #tpu.memory_space<vmem>>, %arg9: memref<1x128xf32, #tpu.memory_space<vmem>>, %arg10: memref<8x128xf32, #tpu.memory_space<vmem>>) attributes {dimension_semantics = [#tpu.dimension_semantics<parallel>], iteration_bounds = array<i64: 1>, scalar_prefetch = 0 : i64, scratch_operands = 0 : i64, tpu.core_type = #tpu.core_type<tc>, window_params = [{transform_indices = @transform_0, window_bounds = array<i64: 8, 16>}, {pipeline_mode = #tpu.pipeline_mode<synchronous>, transform_indices = @transform_1, window_bounds = array<i64: 16, 128>}, {pipeline_mode = #tpu.pipeline_mode<synchronous>, transform_indices = @transform_2, window_bounds = array<i64: 1, 128>}, {pipeline_mode = #tpu.pipeline_mode<synchronous>, transform_indices = @transform_3, window_bounds = array<i64: 128, 128>}, {pipeline_mode = #tpu.pipeline_mode<synchronous>, transform_indices = @transform_4, window_bounds = array<i64: 1, 128>}, {pipeline_mode = #tpu.pipeline_mode<synchronous>, transform_indices = @transform_5, window_bounds = array<i64: 128, 128>}, {pipeline_mode = #tpu.pipeline_mode<synchronous>, transform_indices = @transform_6, window_bounds = array<i64: 1, 128>}, {pipeline_mode = #tpu.pipeline_mode<synchronous>, transform_indices = @transform_7, window_bounds = array<i64: 128, 128>}, {pipeline_mode = #tpu.pipeline_mode<synchronous>, transform_indices = @transform_8, window_bounds = array<i64: 1, 128>}, {transform_indices = @transform_9, window_bounds = array<i64: 8, 128>}]} {
    %c0 = arith.constant 0 : index
    %c0_0 = arith.constant 0 : index
    %0 = vector.load %arg1[%c0, %c0_0] : memref<8x16xf32, #tpu.memory_space<vmem>>, vector<8x16xf32>
    %1 = arith.truncf %0 : vector<8x16xf32> to vector<8x16xbf16>
    %c0_1 = arith.constant 0 : index
    %c0_2 = arith.constant 0 : index
    %2 = vector.load %arg2[%c0_1, %c0_2] : memref<16x128xbf16, #tpu.memory_space<vmem>>, vector<16x128xbf16>
    %cst = arith.constant dense<0.000000e+00> : vector<8x128xf32>
    %3 = tpu.matmul %1, %2, %cst {dimension_numbers = #tpu.dot_dimension_numbers<[1], [0], [0], [1], [0, 0, 1, 1], [], []>} : vector<8x16xbf16>, vector<16x128xbf16>, vector<8x128xf32> -> vector<8x128xf32>
    %c0_3 = arith.constant 0 : index
    %c0_4 = arith.constant 0 : index
    %4 = vector.load %arg3[%c0_3, %c0_4] : memref<1x128xf32, #tpu.memory_space<vmem>>, vector<1x128xf32>
    %5 = vector.broadcast %4 : vector<1x128xf32> to vector<8x128xf32>
    %6 = arith.addf %3, %5 : vector<8x128xf32>
    %cst_5 = arith.constant 0.000000e+00 : f32
    %7 = vector.broadcast %cst_5 : f32 to vector<8x128xf32>
    %8 = arith.maximumf %6, %7 : vector<8x128xf32>
    %9 = arith.truncf %8 : vector<8x128xf32> to vector<8x128xbf16>
    %c0_6 = arith.constant 0 : index
    %c0_7 = arith.constant 0 : index
    %10 = vector.load %arg4[%c0_6, %c0_7] : memref<128x128xbf16, #tpu.memory_space<vmem>>, vector<128x128xbf16>
    %cst_8 = arith.constant dense<0.000000e+00> : vector<8x128xf32>
    %11 = tpu.matmul %9, %10, %cst_8 {dimension_numbers = #tpu.dot_dimension_numbers<[1], [0], [0], [1], [0, 0, 1, 1], [], []>} : vector<8x128xbf16>, vector<128x128xbf16>, vector<8x128xf32> -> vector<8x128xf32>
    %c0_9 = arith.constant 0 : index
    %c0_10 = arith.constant 0 : index
    %12 = vector.load %arg5[%c0_9, %c0_10] : memref<1x128xf32, #tpu.memory_space<vmem>>, vector<1x128xf32>
    %13 = vector.broadcast %12 : vector<1x128xf32> to vector<8x128xf32>
    %14 = arith.addf %11, %13 : vector<8x128xf32>
    %cst_11 = arith.constant 0.000000e+00 : f32
    %15 = vector.broadcast %cst_11 : f32 to vector<8x128xf32>
    %16 = arith.maximumf %14, %15 : vector<8x128xf32>
    %17 = arith.truncf %16 : vector<8x128xf32> to vector<8x128xbf16>
    %c0_12 = arith.constant 0 : index
    %c0_13 = arith.constant 0 : index
    %18 = vector.load %arg6[%c0_12, %c0_13] : memref<128x128xbf16, #tpu.memory_space<vmem>>, vector<128x128xbf16>
    %cst_14 = arith.constant dense<0.000000e+00> : vector<8x128xf32>
    %19 = tpu.matmul %17, %18, %cst_14 {dimension_numbers = #tpu.dot_dimension_numbers<[1], [0], [0], [1], [0, 0, 1, 1], [], []>} : vector<8x128xbf16>, vector<128x128xbf16>, vector<8x128xf32> -> vector<8x128xf32>
    %c0_15 = arith.constant 0 : index
    %c0_16 = arith.constant 0 : index
    %20 = vector.load %arg7[%c0_15, %c0_16] : memref<1x128xf32, #tpu.memory_space<vmem>>, vector<1x128xf32>
    %21 = vector.broadcast %20 : vector<1x128xf32> to vector<8x128xf32>
    %22 = arith.addf %19, %21 : vector<8x128xf32>
    %cst_17 = arith.constant 0.000000e+00 : f32
    %23 = vector.broadcast %cst_17 : f32 to vector<8x128xf32>
    %24 = arith.maximumf %22, %23 : vector<8x128xf32>
    %25 = arith.truncf %24 : vector<8x128xf32> to vector<8x128xbf16>
    %c0_18 = arith.constant 0 : index
    %c0_19 = arith.constant 0 : index
    %26 = vector.load %arg8[%c0_18, %c0_19] : memref<128x128xbf16, #tpu.memory_space<vmem>>, vector<128x128xbf16>
    %cst_20 = arith.constant dense<0.000000e+00> : vector<8x128xf32>
    %27 = tpu.matmul %25, %26, %cst_20 {dimension_numbers = #tpu.dot_dimension_numbers<[1], [0], [0], [1], [0, 0, 1, 1], [], []>} : vector<8x128xbf16>, vector<128x128xbf16>, vector<8x128xf32> -> vector<8x128xf32>
    %c0_21 = arith.constant 0 : index
    %c0_22 = arith.constant 0 : index
    %28 = vector.load %arg9[%c0_21, %c0_22] : memref<1x128xf32, #tpu.memory_space<vmem>>, vector<1x128xf32>
    %29 = vector.broadcast %28 : vector<1x128xf32> to vector<8x128xf32>
    %30 = arith.addf %27, %29 : vector<8x128xf32>
    %31 = tpu.iota {dimensions = array<i32: 1>} : vector<8x128xi32>
    %c8_i32 = arith.constant 8 : i32
    %32 = vector.broadcast %c8_i32 : i32 to vector<8x128xi32>
    %33 = arith.cmpi slt, %31, %32 : vector<8x128xi32>
    %cst_23 = arith.constant 0.000000e+00 : f32
    %34 = vector.broadcast %cst_23 : f32 to vector<8x128xf32>
    %35 = arith.select %33, %34, %30 : vector<8x128xi1>, vector<8x128xf32>
    %36 = math.exp %35 : vector<8x128xf32>
    %37 = arith.select %33, %30, %36 : vector<8x128xi1>, vector<8x128xf32>
    %c0_24 = arith.constant 0 : index
    %c0_25 = arith.constant 0 : index
    %38 = vector.load %arg10[%c0_24, %c0_25] : memref<8x128xf32, #tpu.memory_space<vmem>>, vector<8x128xf32>
    tpu.vector_store %arg10[%c0_24, %c0_25], %37 {strides = array<i32>} : memref<8x128xf32, #tpu.memory_space<vmem>>, vector<8x128xf32>,
    return
  }
  func.func @transform_0(%arg0: i32) -> (i32, i32) {
    %c0_i32 = arith.constant 0 : i32
    %c0_i32_0 = arith.constant 0 : i32
    return %arg0, %c0_i32 : i32, i32
  }
  func.func @transform_1(%arg0: i32) -> (i32, i32) {
    %c0_i32 = arith.constant 0 : i32
    %c0_i32_0 = arith.constant 0 : i32
    %c0_i32_1 = arith.constant 0 : i32
    return %c0_i32, %c0_i32_0 : i32, i32
  }
  func.func @transform_2(%arg0: i32) -> (i32, i32) {
    %c0_i32 = arith.constant 0 : i32
    %c0_i32_0 = arith.constant 0 : i32
    %c0_i32_1 = arith.constant 0 : i32
    return %c0_i32, %c0_i32_0 : i32, i32
  }
  func.func @transform_3(%arg0: i32) -> (i32, i32) {
    %c0_i32 = arith.constant 0 : i32
    %c0_i32_0 = arith.constant 0 : i32
    %c0_i32_1 = arith.constant 0 : i32
    return %c0_i32, %c0_i32_0 : i32, i32
  }
  func.func @transform_4(%arg0: i32) -> (i32, i32) {
    %c0_i32 = arith.constant 0 : i32
    %c0_i32_0 = arith.constant 0 : i32
    %c0_i32_1 = arith.constant 0 : i32
    return %c0_i32, %c0_i32_0 : i32, i32
  }
  func.func @transform_5(%arg0: i32) -> (i32, i32) {
    %c0_i32 = arith.constant 0 : i32
    %c0_i32_0 = arith.constant 0 : i32
    %c0_i32_1 = arith.constant 0 : i32
    return %c0_i32, %c0_i32_0 : i32, i32
  }
  func.func @transform_6(%arg0: i32) -> (i32, i32) {
    %c0_i32 = arith.constant 0 : i32
    %c0_i32_0 = arith.constant 0 : i32
    %c0_i32_1 = arith.constant 0 : i32
    return %c0_i32, %c0_i32_0 : i32, i32
  }
  func.func @transform_7(%arg0: i32) -> (i32, i32) {
    %c0_i32 = arith.constant 0 : i32
    %c0_i32_0 = arith.constant 0 : i32
    %c0_i32_1 = arith.constant 0 : i32
    return %c0_i32, %c0_i32_0 : i32, i32
  }
  func.func @transform_8(%arg0: i32) -> (i32, i32) {
    %c0_i32 = arith.constant 0 : i32
    %c0_i32_0 = arith.constant 0 : i32
    %c0_i32_1 = arith.constant 0 : i32
    return %c0_i32, %c0_i32_0 : i32, i32
  }
  func.func @transform_9(%arg0: i32) -> (i32, i32) {
    %c0_i32 = arith.constant 0 : i32
    %c0_i32_0 = arith.constant 0 : i32
    return %arg0, %c0_i32 : i32, i32
  }
}

module attributes {stable_mosaic.version = 11 : i64} {
  func.func @encoder_kernel(%arg0: i32, %arg1: memref<8x16xf32, #tpu.memory_space<vmem>>, %arg2: memref<16x128xbf16, #tpu.memory_space<vmem>>, %arg3: memref<1x128xf32, #tpu.memory_space<vmem>>, %arg4: memref<128x128xbf16, #tpu.memory_space<vmem>>, %arg5: memref<1x128xf32, #tpu.memory_space<vmem>>, %arg6: memref<128x128xbf16, #tpu.memory_space<vmem>>, %arg7: memref<1x128xf32, #tpu.memory_space<vmem>>, %arg8: memref<128x128xbf16, #tpu.memory_space<vmem>>, %arg9: memref<1x128xf32, #tpu.memory_space<vmem>>, %arg10: memref<8x128xf32, #tpu.memory_space<vmem>>) attributes {dimension_semantics = [#tpu.dimension_semantics<parallel>], iteration_bounds = array<i64: 1>, scalar_prefetch = 0 : i64, scratch_operands = 0 : i64, tpu.core_type = #tpu.core_type<tc>, window_params = [{transform_indices = @transform_0, window_bounds = array<i64: 8, 16>}, {pipeline_mode = #tpu.pipeline_mode<synchronous>, transform_indices = @transform_1, window_bounds = array<i64: 16, 128>}, {pipeline_mode = #tpu.pipeline_mode<synchronous>, transform_indices = @transform_2, window_bounds = array<i64: 1, 128>}, {pipeline_mode = #tpu.pipeline_mode<synchronous>, transform_indices = @transform_3, window_bounds = array<i64: 128, 128>}, {pipeline_mode = #tpu.pipeline_mode<synchronous>, transform_indices = @transform_4, window_bounds = array<i64: 1, 128>}, {pipeline_mode = #tpu.pipeline_mode<synchronous>, transform_indices = @transform_5, window_bounds = array<i64: 128, 128>}, {pipeline_mode = #tpu.pipeline_mode<synchronous>, transform_indices = @transform_6, window_bounds = array<i64: 1, 128>}, {pipeline_mode = #tpu.pipeline_mode<synchronous>, transform_indices = @transform_7, window_bounds = array<i64: 128, 128>}, {pipeline_mode = #tpu.pipeline_mode<synchronous>, transform_indices = @transform_8, window_bounds = array<i64: 1, 128>}, {transform_indices = @transform_9, window_bounds = array<i64: 8, 128>}]} {
    %c0 = arith.constant 0 : index
    %c0_0 = arith.constant 0 : index
    %0 = vector.load %arg1[%c0, %c0_0] : memref<8x16xf32, #tpu.memory_space<vmem>>, vector<8x16xf32>
    %1 = arith.truncf %0 : vector<8x16xf32> to vector<8x16xbf16>
    %c0_1 = arith.constant 0 : index
    %c0_2 = arith.constant 0 : index
    %2 = vector.load %arg2[%c0_1, %c0_2] : memref<16x128xbf16, #tpu.memory_space<vmem>>, vector<16x128xbf16>
    %cst = arith.constant dense<0.000000e+00> : vector<8x128xf32>
    %3 = tpu.matmul %1, %2, %cst {dimension_numbers = #tpu.dot_dimension_numbers<[1], [0], [0], [1], [0, 0, 1, 1], [], []>} : vector<8x16xbf16>, vector<16x128xbf16>, vector<8x128xf32> -> vector<8x128xf32>
    %c0_3 = arith.constant 0 : index
    %c0_4 = arith.constant 0 : index
    %4 = vector.load %arg3[%c0_3, %c0_4] : memref<1x128xf32, #tpu.memory_space<vmem>>, vector<1x128xf32>
    %5 = vector.broadcast %4 : vector<1x128xf32> to vector<8x128xf32>
    %6 = arith.addf %3, %5 : vector<8x128xf32>
    %cst_5 = arith.constant 0.000000e+00 : f32
    %7 = vector.broadcast %cst_5 : f32 to vector<8x128xf32>
    %8 = arith.maximumf %6, %7 : vector<8x128xf32>
    %9 = arith.truncf %8 : vector<8x128xf32> to vector<8x128xbf16>
    %c0_6 = arith.constant 0 : index
    %c0_7 = arith.constant 0 : index
    %10 = vector.load %arg4[%c0_6, %c0_7] : memref<128x128xbf16, #tpu.memory_space<vmem>>, vector<128x128xbf16>
    %cst_8 = arith.constant dense<0.000000e+00> : vector<8x128xf32>
    %11 = tpu.matmul %9, %10, %cst_8 {dimension_numbers = #tpu.dot_dimension_numbers<[1], [0], [0], [1], [0, 0, 1, 1], [], []>} : vector<8x128xbf16>, vector<128x128xbf16>, vector<8x128xf32> -> vector<8x128xf32>
    %c0_9 = arith.constant 0 : index
    %c0_10 = arith.constant 0 : index
    %12 = vector.load %arg5[%c0_9, %c0_10] : memref<1x128xf32, #tpu.memory_space<vmem>>, vector<1x128xf32>
    %13 = vector.broadcast %12 : vector<1x128xf32> to vector<8x128xf32>
    %14 = arith.addf %11, %13 : vector<8x128xf32>
    %cst_11 = arith.constant 0.000000e+00 : f32
    %15 = vector.broadcast %cst_11 : f32 to vector<8x128xf32>
    %16 = arith.maximumf %14, %15 : vector<8x128xf32>
    %17 = arith.truncf %16 : vector<8x128xf32> to vector<8x128xbf16>
    %c0_12 = arith.constant 0 : index
    %c0_13 = arith.constant 0 : index
    %18 = vector.load %arg6[%c0_12, %c0_13] : memref<128x128xbf16, #tpu.memory_space<vmem>>, vector<128x128xbf16>
    %cst_14 = arith.constant dense<0.000000e+00> : vector<8x128xf32>
    %19 = tpu.matmul %17, %18, %cst_14 {dimension_numbers = #tpu.dot_dimension_numbers<[1], [0], [0], [1], [0, 0, 1, 1], [], []>} : vector<8x128xbf16>, vector<128x128xbf16>, vector<8x128xf32> -> vector<8x128xf32>
    %c0_15 = arith.constant 0 : index
    %c0_16 = arith.constant 0 : index
    %20 = vector.load %arg7[%c0_15, %c0_16] : memref<1x128xf32, #tpu.memory_space<vmem>>, vector<1x128xf32>
    %21 = vector.broadcast %20 : vector<1x128xf32> to vector<8x128xf32>
    %22 = arith.addf %19, %21 : vector<8x128xf32>
    %cst_17 = arith.constant 0.000000e+00 : f32
    %23 = vector.broadcast %cst_17 : f32 to vector<8x128xf32>
    %24 = arith.maximumf %22, %23 : vector<8x128xf32>
    %25 = arith.truncf %24 : vector<8x128xf32> to vector<8x128xbf16>
    %c0_18 = arith.constant 0 : index
    %c0_19 = arith.constant 0 : index
    %26 = vector.load %arg8[%c0_18, %c0_19] : memref<128x128xbf16, #tpu.memory_space<vmem>>, vector<128x128xbf16>
    %cst_20 = arith.constant dense<0.000000e+00> : vector<8x128xf32>
    %27 = tpu.matmul %25, %26, %cst_20 {dimension_numbers = #tpu.dot_dimension_numbers<[1], [0], [0], [1], [0, 0, 1, 1], [], []>} : vector<8x128xbf16>, vector<128x128xbf16>, vector<8x128xf32> -> vector<8x128xf32>
    %c0_21 = arith.constant 0 : index
    %c0_22 = arith.constant 0 : index
    %28 = vector.load %arg9[%c0_21, %c0_22] : memref<1x128xf32, #tpu.memory_space<vmem>>, vector<1x128xf32>
    %29 = vector.broadcast %28 : vector<1x128xf32> to vector<8x128xf32>
    %30 = arith.addf %27, %29 : vector<8x128xf32>
    %31 = tpu.iota {dimensions = array<i32: 1>} : vector<8x128xi32>
    %c8_i32 = arith.constant 8 : i32
    %32 = vector.broadcast %c8_i32 : i32 to vector<8x128xi32>
    %33 = arith.cmpi slt, %31, %32 : vector<8x128xi32>
    %cst_23 = arith.constant 0.000000e+00 : f32
    %34 = vector.broadcast %cst_23 : f32 to vector<8x128xf32>
    %35 = arith.select %33, %34, %30 : vector<8x128xi1>, vector<8x128xf32>
    %36 = math.exp %35 : vector<8x128xf32>
    %37 = arith.select %33, %30, %36 : vector<8x128xi1>, vector<8x128xf32>
    %c0_24 = arith.constant 0 : index
    %c0_25 = arith.constant 0 : index
    %38 = vector.load %arg10[%c0_24, %c0_25] : memref<8x128xf32, #tpu.memory_space<vmem>>, vector<8x128xf32>
    tpu.vector_store %arg10[%c0_24, %c0_25], %37 {strides = array<i32>} : memref<8x128xf32, #tpu.memory_space<vmem>>, vector<8x128xf32>,
    return
  }
  func.func @transform_0(%arg0: i32) -> (i32, i32) {
    %c0_i32 = arith.constant 0 : i32
    %c0_i32_0 = arith.constant 0 : i32
    return %arg0, %c0_i32 : i32, i32
  }
  func.func @transform_1(%arg0: i32) -> (i32, i32) {
    %c0_i32 = arith.constant 0 : i32
    %c0_i32_0 = arith.constant 0 : i32
    %c0_i32_1 = arith.constant 0 : i32
    return %c0_i32, %c0_i32_0 : i32, i32
  }
  func.func @transform_2(%arg0: i32) -> (i32, i32) {
    %c0_i32 = arith.constant 0 : i32
    %c0_i32_0 = arith.constant 0 : i32
    %c0_i32_1 = arith.constant 0 : i32
    return %c0_i32, %c0_i32_0 : i32, i32
  }
  func.func @transform_3(%arg0: i32) -> (i32, i32) {
    %c0_i32 = arith.constant 0 : i32
    %c0_i32_0 = arith.constant 0 : i32
    %c0_i32_1 = arith.constant 0 : i32
    return %c0_i32, %c0_i32_0 : i32, i32
  }
  func.func @transform_4(%arg0: i32) -> (i32, i32) {
    %c0_i32 = arith.constant 0 : i32
    %c0_i32_0 = arith.constant 0 : i32
    %c0_i32_1 = arith.constant 0 : i32
    return %c0_i32, %c0_i32_0 : i32, i32
  }
  func.func @transform_5(%arg0: i32) -> (i32, i32) {
    %c0_i32 = arith.constant 0 : i32
    %c0_i32_0 = arith.constant 0 : i32
    %c0_i32_1 = arith.constant 0 : i32
    return %c0_i32, %c0_i32_0 : i32, i32
  }
  func.func @transform_6(%arg0: i32) -> (i32, i32) {
    %c0_i32 = arith.constant 0 : i32
    %c0_i32_0 = arith.constant 0 : i32
    %c0_i32_1 = arith.constant 0 : i32
    return %c0_i32, %c0_i32_0 : i32, i32
  }
  func.func @transform_7(%arg0: i32) -> (i32, i32) {
    %c0_i32 = arith.constant 0 : i32
    %c0_i32_0 = arith.constant 0 : i32
    %c0_i32_1 = arith.constant 0 : i32
    return %c0_i32, %c0_i32_0 : i32, i32
  }
  func.func @transform_8(%arg0: i32) -> (i32, i32) {
    %c0_i32 = arith.constant 0 : i32
    %c0_i32_0 = arith.constant 0 : i32
    %c0_i32_1 = arith.constant 0 : i32
    return %c0_i32, %c0_i32_0 : i32, i32
  }
  func.func @transform_9(%arg0: i32) -> (i32, i32) {
    %c0_i32 = arith.constant 0 : i32
    %c0_i32_0 = arith.constant 0 : i32
    return %arg0, %c0_i32 : i32, i32
  }
}

</mosaic_0001>

<bundles_post_ra>
// kernel: tpu_custom_call.1
= control target key start
LH: loop header
LB: loop body
LE: loop exit
PB: predicated region body
PF: predicated region fallthrough
CT: control target
= control target key end

     0   :  { %14 = vsyncpa [#allocation3], 0  ;;  %s1016_s0 = inlined_call_operand.hbm [shape: f32[8,16], index: 0, kind: input, shape index: {}]   ;;  %s1017_s1 = inlined_call_operand.hbm [shape: bf16[16,128], index: 1, kind: input, shape index: {}]   ;;  %s1018_s2 = inlined_call_operand.vmem [shape: f32[1,128], index: 2, kind: input, shape index: {}]   ;;  %s1019_s3 = inlined_call_operand.hbm [shape: bf16[128,128], index: 3, kind: input, shape index: {}]   ;;  %s1020_s4 = inlined_call_operand.vmem [shape: f32[1,128], index: 4, kind: input, shape index: {}]   ;;  %s1021_s5 = inlined_call_operand.hbm [shape: bf16[128,128], index: 5, kind: input, shape index: {}]   ;;  %s1022_s6 = inlined_call_operand.vmem [shape: f32[1,128], index: 6, kind: input, shape index: {}]   ;;  %s1023_s7 = inlined_call_operand.hbm [shape: bf16[128,128], index: 7, kind: input, shape index: {}]   ;;  %s1024_s8 = inlined_call_operand.vmem [shape: f32[1,128], index: 8, kind: input, shape index: {}]   ;;  %s1025_s9 = inlined_call_operand.hbm [shape: f32[8,128], index: 9, kind: output, shape index: {}]  }
   0x1   :  { %15 = vsyncpa [#allocation6], 0 }
   0x2   :  { %16 = vsyncpa [#allocation9], 0 }
   0x3   :  { %17 = vsyncpa [#allocation4], 0  ;;  %s827_s30 = smov [#allocation5]   ;;  %s687_s13 = scalar_lea.hbm %s1017_s1, 128 }
   0x4   :  { %s33_s10 = sshll.u32 %s827_s30, 4  ;;  %p688_p0 = scmp.ne.s32.totalorder %s1017_s1, %s687_s13  ;;  %s34_s10 = int_to_ptr.vmem [resolvable:$true] %s33_s10 }
   0x5   :  { %p691_p1 = scmp.lt.u32.totalorder %s687_s13, %s1017_s1 }
   0x7   :  { %p693_p2 = pnand %p691_p1, %p688_p0 }
   0x9   :  { %696 = shalt.err (!%p693_p2)
}
   0xa   :  { %s697_s18 = scalar_lea.vmem %s34_s10, 128  ;;  %p702_p4 = scmp.lt.s32.totalorder %s34_s10, %s34_s10 }
   0xb   :  { %p698_p3 = scmp.ne.s32.totalorder %s34_s10, %s697_s18  ;;  %p703_p5 = scmp.lt.s32.totalorder %s697_s18, %s697_s18 }
   0xd   :  { %p704_p6 = por %p703_p5, %p702_p4 }
   0xf   :  { %p705_p7 = pnand %p704_p6, %p698_p3 }
  0x11   :  { %708 = shalt.err (!%p705_p7)
}
  0x12   :  { %s828_s19 = smov 64   ;;  %s829_s20 = smov 4  }
  0x13   :  { %39 = dma.hbm_to_vmem [thread:$0]  %s1017_s1, 128, %s34_s10, [#allocation6], %s828_s19, %s828_s19, %s829_s20  }
  0x14   :  { %s830_s23 = smov [#allocation8]   ;;  %s831_s25 = smov [#allocation2]  }
  0x15   :  { %s61_s24 = sshll.u32 %s830_s23, 4  ;;  %s24_s26 = sshll.u32 %s831_s25, 4  ;;  %s62_s24 = int_to_ptr.vmem [resolvable:$true] %s61_s24  ;;  %s25_s26 = int_to_ptr.vmem [resolvable:$true] %s24_s26 }
  0x16   :  { %s709_s29 = scalar_lea.hbm %s1021_s5, 1024 }
  0x17   :  { %p710_p8 = scmp.ne.s32.totalorder %s1021_s5, %s709_s29  ;;  %p713_p9 = scmp.lt.u32.totalorder %s709_s29, %s1021_s5 }
  0x19   :  { %p715_p10 = pnand %p713_p9, %p710_p8 }
  0x1b   :  { %718 = shalt.err (!%p715_p10)
}
  0x1c   :  { %s719_s1 = scalar_lea.vmem %s62_s24, 1024  ;;  %p724_p12 = scmp.lt.s32.totalorder %s62_s24, %s62_s24 }
  0x1d   :  { %p720_p11 = scmp.ne.s32.totalorder %s62_s24, %s719_s1  ;;  %p725_p13 = scmp.lt.s32.totalorder %s719_s1, %s719_s1 }
  0x1f   :  { %p726_p0 = por %p725_p13, %p724_p12 }
  0x21   :  { %p727_p1 = pnand %p726_p0, %p720_p11 }
  0x23   :  { %730 = shalt.err (!%p727_p1)
}
  0x24   :  { %67 = dma.hbm_to_vmem [thread:$0]  %s1021_s5, 1024, %s62_s24, [#allocation9], %s828_s19, %s828_s19, %s829_s20  }
  0x25   :  { %s731_s17 = scalar_lea.hbm %s1016_s0, 128 }
  0x26   :  { %p732_p2 = scmp.ne.s32.totalorder %s1016_s0, %s731_s17  ;;  %p735_p3 = scmp.lt.u32.totalorder %s731_s17, %s1016_s0 }
  0x28   :  { %p737_p4 = pnand %p735_p3, %p732_p2 }
  0x2a   :  { %740 = shalt.err (!%p737_p4)
}
  0x2b   :  { %s741_s25 = scalar_lea.vmem %s25_s26, 128  ;;  %p746_p6 = scmp.lt.s32.totalorder %s25_s26, %s25_s26 }
  0x2c   :  { %p742_p5 = scmp.ne.s32.totalorder %s25_s26, %s741_s25  ;;  %p747_p7 = scmp.lt.s32.totalorder %s741_s25, %s741_s25 }
  0x2e   :  { %p748_p8 = por %p747_p7, %p746_p6 }
  0x30   :  { %p749_p9 = pnand %p748_p8, %p742_p5 }
  0x32   :  { %752 = shalt.err (!%p749_p9)
}
  0x33   :  { %27 = dma.hbm_to_vmem [thread:$0]  %s1016_s0, 128, %s25_s26, [#allocation3]  }
  0x34   :  { %s832_s27 = smov [#allocation7]   ;;  %s833_s29 = smov [#allocation10]  }
  0x35   :  { %s47_s28 = sshll.u32 %s832_s27, 4  ;;  %s75_s30 = sshll.u32 %s833_s29, 4  ;;  %s48_s28 = int_to_ptr.vmem [resolvable:$true] %s47_s28  ;;  %s76_s30 = int_to_ptr.vmem [resolvable:$true] %s75_s30 }
  0x36   :  { %s753_s13 = scalar_lea.hbm %s1019_s3, 1024 }
  0x37   :  { %p754_p10 = scmp.ne.s32.totalorder %s1019_s3, %s753_s13  ;;  %p757_p11 = scmp.lt.u32.totalorder %s753_s13, %s1019_s3 }
  0x39   :  { %p759_p12 = pnand %p757_p11, %p754_p10 }
  0x3b   :  { %762 = shalt.err (!%p759_p12)
}
  0x3c   :  { %s763_s0 = scalar_lea.vmem %s48_s28, 1024  ;;  %p768_p0 = scmp.lt.s32.totalorder %s48_s28, %s48_s28 }
  0x3d   :  { %p764_p13 = scmp.ne.s32.totalorder %s48_s28, %s763_s0  ;;  %p769_p1 = scmp.lt.s32.totalorder %s763_s0, %s763_s0 }
  0x3f   :  { %p770_p2 = por %p769_p1, %p768_p0 }
  0x41   :  { %p771_p3 = pnand %p770_p2, %p764_p13 }
  0x43   :  { %774 = shalt.err (!%p771_p3)
}
  0x44   :  { %53 = dma.hbm_to_vmem [thread:$0]  %s1019_s3, 1024, %s48_s28, [#allocation6], %s828_s19, %s828_s19, %s829_s20  }
  0x45   :  { %s775_s21 = scalar_lea.hbm %s1023_s7, 1024 }
  0x46   :  { %p776_p4 = scmp.ne.s32.totalorder %s1023_s7, %s775_s21  ;;  %p779_p5 = scmp.lt.u32.totalorder %s775_s21, %s1023_s7 }
  0x48   :  { %p781_p6 = pnand %p779_p5, %p776_p4 }
  0x4a   :  { %784 = shalt.err (!%p781_p6)
}
  0x4b   :  { %s785_s24 = scalar_lea.vmem %s76_s30, 1024  ;;  %p790_p8 = scmp.lt.s32.totalorder %s76_s30, %s76_s30 }
  0x4c   :  { %p786_p7 = scmp.ne.s32.totalorder %s76_s30, %s785_s24  ;;  %p791_p9 = scmp.lt.s32.totalorder %s785_s24, %s785_s24 }
  0x4e   :  { %p792_p10 = por %p791_p9, %p790_p8 }
  0x50   :  { %p793_p11 = pnand %p792_p10, %p786_p7 }
  0x52   :  { %796 = shalt.err (!%p793_p11)
}
  0x53   :  { %81 = dma.hbm_to_vmem [thread:$0]  %s1023_s7, 1024, %s76_s30, [#allocation9], %s828_s19, %s828_s19, %s829_s20  }
  0x54   :  { %819 = dma.done.wait [#allocation3], 128  }
  0x55   :  { %820 = vsyncadd [#allocation3], 4294967168 }
  0x56   :  { %821 = dma.done.wait [#allocation6], 1152  }
  0x57   :  { %822 = vsyncadd [#allocation6], 4294966144 }
  0x58   :  { %823 = dma.done.wait [#allocation9], 2048  }
  0x59   :  { %824 = vsyncadd [#allocation9], 4294965248  ;;  %v834_v0 = vmov 0.0   ;;  %vm835_vm0 = vmmov 0   ;;  %v660_v1 = vld [vmem:[#allocation5] sm:$0xff]   ;;  %v100_v2 = vld [vmem:[#allocation2] sm:$0xff]  ;;  %v500_v52 = vlaneseq }
  0x5a   :  { %584 = vmatprep.subr.bf16.mxu0 %v834_v0  ;;  %586 = vmatprep.mubr.msk.bf16.mxu0 %vm835_vm0, %v834_v0  ;;  %v101_v3 = vpack.c.bf16 %v100_v2, %v100_v2  ;;  %vm117_vm1 = vcmask 130048   ;;  %v661_v4 = vld [vmem:[#allocation7] sm:$0xff]   ;;  %v662_v5 = vld [vmem:[#allocation7 + $0x8] sm:$0xff]   ;;  %v663_v6 = vld [vmem:[#allocation7 + $0x10] sm:$0xff]  }
  0x5b   :  { %590 = vmatprep.subr.bf16.mxu1 %v834_v0  ;;  %606 = vmatprep.mubr.msk.bf16.mxu1 %vm835_vm0, %v834_v0  ;;  %v664_v7 = vld [vmem:[#allocation7 + $0x18] sm:$0xff]   ;;  %v665_v8 = vld [vmem:[#allocation7 + $0x20] sm:$0xff]   ;;  %v666_v9 = vld [vmem:[#allocation7 + $0x28] sm:$0xff]   ;;  %v501_v53 = vand.u32 127, %v500_v52 }
  0x5c   :  { %585 = vmatpush3.bf16.msra.mxu0 %v660_v1  ;;  %591 = vmatpush3.bf16.msra.mxu1 %v661_v4  ;;  %v667_v10 = vld [vmem:[#allocation7 + $0x30] sm:$0xff]   ;;  %v668_v11 = vld [vmem:[#allocation7 + $0x38] sm:$0xff]   ;;  %v669_v12 = vld [vmem:[#allocation8] sm:$0xff]  }
  0x5d   :  { %610 = vmatprep.subr.bf16.mxu0 %v834_v0  ;;  %592 = vmatprep.subr.bf16.mxu1 %v834_v0  ;;  %v670_v13 = vld [vmem:[#allocation8 + $0x8] sm:$0xff]   ;;  %v671_v14 = vld [vmem:[#allocation8 + $0x10] sm:$0xff]   ;;  %v672_v15 = vld [vmem:[#allocation8 + $0x18] sm:$0xff]   ;;  %vm502_vm2 = vcmp.lt.s32.totalorder %v501_v53, 8 }
  0x5e   :  { %v673_v16 = vld [vmem:[#allocation8 + $0x20] sm:$0xff]   ;;  %v674_v17 = vld [vmem:[#allocation8 + $0x28] sm:$0xff]   ;;  %v525_v18 = vld [vmem:[%s1018_s2] ss:$0 sm:$0xff] }
  0x5f   :  { %587 = vmatmul.mubr.msk.bf16.vlgmr.msra.gmra.mrb[0].mxu0 %vm117_vm1, %v101_v3  ;;  %v675_v26 = vld [vmem:[#allocation8 + $0x30] sm:$0xff]   ;;  %v676_v27 = vld [vmem:[#allocation8 + $0x38] sm:$0xff]   ;;  %v677_v28 = vld [vmem:[#allocation10] sm:$0xff]  }
  0x60   :  { %626 = vmatprep.mubr.msk.bf16.mxu0 %vm835_vm0, %v834_v0  ;;  %593 = vmatpush3.bf16.msra.mxu1 %v662_v5  ;;  %v678_v29 = vld [vmem:[#allocation10 + $0x8] sm:$0xff]   ;;  %v679_v30 = vld [vmem:[#allocation10 + $0x10] sm:$0xff]   ;;  %v680_v31 = vld [vmem:[#allocation10 + $0x18] sm:$0xff]  }
  0x61   :  { %594 = vmatprep.subr.bf16.mxu1 %v834_v0  ;;  %611 = vmatpush3.bf16.msra.mxu0 %v669_v12  ;;  %v681_v32 = vld [vmem:[#allocation10 + $0x20] sm:$0xff]   ;;  %v682_v33 = vld [vmem:[#allocation10 + $0x28] sm:$0xff]   ;;  %v528_v34 = vld [vmem:[%s1020_s4] ss:$0 sm:$0xff] }
  0x62   :  { %612 = vmatprep.subr.bf16.mxu0 %v834_v0  ;;  %v683_v42 = vld [vmem:[#allocation10 + $0x30] sm:$0xff]   ;;  %v684_v43 = vld [vmem:[#allocation10 + $0x38] sm:$0xff]  }
  0x63   :  { %v537_v44 = vld [vmem:[%s1022_s6] ss:$0 sm:$0xff]  ;;  %s836_s6 = smov [#allocation11]  }
  0x64   :  { %595 = vmatpush3.bf16.msra.mxu1 %v663_v6  ;;  %v546_v54 = vld [vmem:[%s1024_s8] ss:$0 sm:$0xff]  ;;  %s514_s11 = sshll.u32 %s836_s6, 4  ;;  %s515_s11 = int_to_ptr.vmem [resolvable:$true] %s514_s11 }
  0x65   :  { %596 = vmatprep.subr.bf16.mxu1 %v834_v0  ;;  %613 = vmatpush3.bf16.msra.mxu0 %v670_v13  ;;  %s797_s12 = scalar_lea.vmem %s515_s11, 128  ;;  %p802_p13 = scmp.lt.s32.totalorder %s515_s11, %s515_s11 }
  0x66   :  { %614 = vmatprep.subr.bf16.mxu0 %v834_v0  ;;  %p798_p12 = scmp.ne.s32.totalorder %s515_s11, %s797_s12  ;;  %p803_p0 = scmp.lt.s32.totalorder %s797_s12, %s797_s12 }
  0x68   :  { %597 = vmatpush3.bf16.msra.mxu1 %v664_v7  ;;  %p804_p1 = por %p803_p0, %p802_p13 }
  0x69   :  { %598 = vmatprep.subr.bf16.mxu1 %v834_v0  ;;  %615 = vmatpush3.bf16.msra.mxu0 %v671_v14 }
  0x6a   :  { %616 = vmatprep.subr.bf16.mxu0 %v834_v0  ;;  %p805_p2 = pnand %p804_p1, %p798_p12 }
  0x6c   :  { %599 = vmatpush3.bf16.msra.mxu1 %v665_v8 }
  0x6d   :  { %600 = vmatprep.subr.bf16.mxu1 %v834_v0  ;;  %617 = vmatpush3.bf16.msra.mxu0 %v672_v15 }
  0x6e   :  { %618 = vmatprep.subr.bf16.mxu0 %v834_v0 }
  0x70   :  { %601 = vmatpush3.bf16.msra.mxu1 %v666_v9 }
  0x71   :  { %602 = vmatprep.subr.bf16.mxu1 %v834_v0  ;;  %619 = vmatpush3.bf16.msra.mxu0 %v673_v16 }
  0x72   :  { %620 = vmatprep.subr.bf16.mxu0 %v834_v0 }
  0x74   :  { %603 = vmatpush3.bf16.msra.mxu1 %v667_v10 }
  0x75   :  { %604 = vmatprep.subr.bf16.mxu1 %v834_v0  ;;  %621 = vmatpush3.bf16.msra.mxu0 %v674_v17 }
  0x76   :  { %622 = vmatprep.subr.bf16.mxu0 %v834_v0 }
  0x78   :  { %605 = vmatpush3.bf16.msra.mxu1 %v668_v11 }
  0x79   :  { %630 = vmatprep.subr.bf16.mxu1 %v834_v0  ;;  %623 = vmatpush3.bf16.msra.mxu0 %v675_v26 }
  0x7a   :  { %624 = vmatprep.subr.bf16.mxu0 %v834_v0 }
  0x7d   :  { %625 = vmatpush3.bf16.msra.mxu0 %v676_v27 }
 0x132   :  { %v155_v19 = vpop.f32.mrb[0].mxu0 }
 0x133   :  { %v156_v20 = vadd.f32 %v525_v18, %v155_v19  ;;  %v588_v21 = vpop.f32.mrb[1].mxu0 }
 0x134   :  { %v158_v22 = vpop.f32.mrb[2].mxu0 }
 0x135   :  { %v161_v23 = vmax.f32 %v156_v20, 0.0  ;;  %v589_v24 = vpop.f32.mrb[3].mxu0 }
 0x137   :  { %v162_v25 = vpack.c.bf16 %v161_v23, %v161_v23 }
 0x139   :  { %607 = vmatmul.mubr.bf16.vlgmr.msra.gmra.mrb[0].mxu1 %v162_v25 }
 0x13a   :  { %646 = vmatprep.mubr.msk.bf16.mxu1 %vm835_vm0, %v834_v0  ;;  %631 = vmatpush3.bf16.msra.mxu1 %v677_v28 }
 0x13b   :  { %632 = vmatprep.subr.bf16.mxu1 %v834_v0 }
 0x13e   :  { %633 = vmatpush3.bf16.msra.mxu1 %v678_v29 }
 0x13f   :  { %634 = vmatprep.subr.bf16.mxu1 %v834_v0 }
 0x142   :  { %635 = vmatpush3.bf16.msra.mxu1 %v679_v30 }
 0x143   :  { %636 = vmatprep.subr.bf16.mxu1 %v834_v0 }
 0x146   :  { %637 = vmatpush3.bf16.msra.mxu1 %v680_v31 }
 0x147   :  { %638 = vmatprep.subr.bf16.mxu1 %v834_v0 }
 0x14a   :  { %639 = vmatpush3.bf16.msra.mxu1 %v681_v32 }
 0x14b   :  { %640 = vmatprep.subr.bf16.mxu1 %v834_v0 }
 0x14e   :  { %641 = vmatpush3.bf16.msra.mxu1 %v682_v33 }
 0x14f   :  { %642 = vmatprep.subr.bf16.mxu1 %v834_v0 }
 0x152   :  { %643 = vmatpush3.bf16.msra.mxu1 %v683_v42 }
 0x153   :  { %644 = vmatprep.subr.bf16.mxu1 %v834_v0 }
 0x156   :  { %645 = vmatpush3.bf16.msra.mxu1 %v684_v43 }
 0x20c   :  { %v268_v35 = vpop.f32.mrb[0].mxu1 }
 0x20d   :  { %v269_v36 = vadd.f32 %v528_v34, %v268_v35  ;;  %v608_v37 = vpop.f32.mrb[1].mxu1 }
 0x20e   :  { %v271_v38 = vpop.f32.mrb[2].mxu1 }
 0x20f   :  { %v274_v39 = vmax.f32 %v269_v36, 0.0  ;;  %v609_v40 = vpop.f32.mrb[3].mxu1 }
 0x211   :  { %v275_v41 = vpack.c.bf16 %v274_v39, %v274_v39 }
 0x213   :  { %627 = vmatmul.mubr.bf16.vlgmr.msra.gmra.mrb[4].mxu0 %v275_v41 }
 0x2e6   :  { %v381_v45 = vpop.f32.mrb[4].mxu0 }
 0x2e7   :  { %v382_v46 = vadd.f32 %v537_v44, %v381_v45  ;;  %v628_v47 = vpop.f32.mrb[5].mxu0 }
 0x2e8   :  { %v384_v48 = vpop.f32.mrb[6].mxu0 }
 0x2e9   :  { %v387_v49 = vmax.f32 %v382_v46, 0.0  ;;  %v629_v50 = vpop.f32.mrb[7].mxu0 }
 0x2eb   :  { %v388_v51 = vpack.c.bf16 %v387_v49, %v387_v49 }
 0x2ed   :  { %647 = vmatmul.mubr.bf16.vlgmr.msra.gmra.mrb[4].mxu1 %v388_v51 }
 0x3c0   :  { %v494_v55 = vpop.f32.mrb[4].mxu1 }
 0x3c1   :  { %v495_v56 = vadd.f32 %v546_v54, %v494_v55  ;;  %v648_v57 = vpop.f32.mrb[5].mxu1 }
 0x3c2   :  { %v497_v58 = vpop.f32.mrb[6].mxu1 }
 0x3c3   :  { %v503_v59 = vsel %vm502_vm2, 0.0, %v495_v56  ;;  %v649_v60 = vpop.f32.mrb[7].mxu1 }
 0x3c4   :  { %v504_v61 = vmul.f32 1.442695, %v503_v59 }
 0x3c6   :  { %685 = vpow2.f32 %v504_v61 }
 0x3d0   :  { %v686_v62 = vpop.eup %685 }
 0x3d1   :  { %v506_v63 = vsel %vm502_vm2, %v495_v56, %v686_v62 }
 0x3d2   :  { %507 = vst [vmem:[#allocation11] sm:$0xff] %v506_v63 }
 0x3d3   :  { %808 = shalt.err (!%p805_p2)
}
 0x3d4   :  { %s809_s1 = scalar_lea.hbm %s1025_s9, 128 }
 0x3d5   :  { %p810_p3 = scmp.ne.s32.totalorder %s1025_s9, %s809_s1  ;;  %p813_p4 = scmp.lt.u32.totalorder %s809_s1, %s1025_s9 }
 0x3d7   :  { %p815_p5 = pnand %p813_p4, %p810_p3 }
 0x3d9   :  { %818 = shalt.err (!%p815_p5)
}
 0x3da   :  { %517 = dma.vmem_to_hbm [thread:$0]  %s515_s11, 128, %s1025_s9, [#allocation4]  }
 0x3db   :  { %825 = dma.done.wait [#allocation4], 128  }
 0x3dc   :  { %826 = vsyncadd [#allocation4], 4294967168 }
 0x3dd   :  { %521 = vsyncpa [#allocation3], 1 }
 0x3de   :  { %522 = vsyncpa [#allocation6], 1 }
 0x3df   :  { %523 = vsyncpa [#allocation9], 1 }
 0x3e0   :  { %524 = vsyncpa [#allocation4], 1 }

// kernel: tpu_custom_call.1
= control target key start
LH: loop header
LB: loop body
LE: loop exit
PB: predicated region body
PF: predicated region fallthrough
CT: control target
= control target key end

     0   :  { %14 = vsyncpa [#allocation3], 0  ;;  %s1016_s0 = inlined_call_operand.hbm [shape: f32[8,16], index: 0, kind: input, shape index: {}]   ;;  %s1017_s1 = inlined_call_operand.hbm [shape: bf16[16,128], index: 1, kind: input, shape index: {}]   ;;  %s1018_s2 = inlined_call_operand.vmem [shape: f32[1,128], index: 2, kind: input, shape index: {}]   ;;  %s1019_s3 = inlined_call_operand.hbm [shape: bf16[128,128], index: 3, kind: input, shape index: {}]   ;;  %s1020_s4 = inlined_call_operand.vmem [shape: f32[1,128], index: 4, kind: input, shape index: {}]   ;;  %s1021_s5 = inlined_call_operand.hbm [shape: bf16[128,128], index: 5, kind: input, shape index: {}]   ;;  %s1022_s6 = inlined_call_operand.vmem [shape: f32[1,128], index: 6, kind: input, shape index: {}]   ;;  %s1023_s7 = inlined_call_operand.hbm [shape: bf16[128,128], index: 7, kind: input, shape index: {}]   ;;  %s1024_s8 = inlined_call_operand.vmem [shape: f32[1,128], index: 8, kind: input, shape index: {}]   ;;  %s1025_s9 = inlined_call_operand.hbm [shape: f32[8,128], index: 9, kind: output, shape index: {}]  }
   0x1   :  { %15 = vsyncpa [#allocation6], 0 }
   0x2   :  { %16 = vsyncpa [#allocation9], 0 }
   0x3   :  { %17 = vsyncpa [#allocation4], 0  ;;  %s827_s30 = smov [#allocation5]   ;;  %s687_s13 = scalar_lea.hbm %s1017_s1, 128 }
   0x4   :  { %s33_s10 = sshll.u32 %s827_s30, 4  ;;  %p688_p0 = scmp.ne.s32.totalorder %s1017_s1, %s687_s13  ;;  %s34_s10 = int_to_ptr.vmem [resolvable:$true] %s33_s10 }
   0x5   :  { %p691_p1 = scmp.lt.u32.totalorder %s687_s13, %s1017_s1 }
   0x7   :  { %p693_p2 = pnand %p691_p1, %p688_p0 }
   0x9   :  { %696 = shalt.err (!%p693_p2)
}
   0xa   :  { %s697_s18 = scalar_lea.vmem %s34_s10, 128  ;;  %p702_p4 = scmp.lt.s32.totalorder %s34_s10, %s34_s10 }
   0xb   :  { %p698_p3 = scmp.ne.s32.totalorder %s34_s10, %s697_s18  ;;  %p703_p5 = scmp.lt.s32.totalorder %s697_s18, %s697_s18 }
   0xd   :  { %p704_p6 = por %p703_p5, %p702_p4 }
   0xf   :  { %p705_p7 = pnand %p704_p6, %p698_p3 }
  0x11   :  { %708 = shalt.err (!%p705_p7)
}
  0x12   :  { %s828_s19 = smov 64   ;;  %s829_s20 = smov 4  }
  0x13   :  { %39 = dma.hbm_to_vmem [thread:$0]  %s1017_s1, 128, %s34_s10, [#allocation6], %s828_s19, %s828_s19, %s829_s20  }
  0x14   :  { %s830_s23 = smov [#allocation8]   ;;  %s831_s25 = smov [#allocation2]  }
  0x15   :  { %s61_s24 = sshll.u32 %s830_s23, 4  ;;  %s24_s26 = sshll.u32 %s831_s25, 4  ;;  %s62_s24 = int_to_ptr.vmem [resolvable:$true] %s61_s24  ;;  %s25_s26 = int_to_ptr.vmem [resolvable:$true] %s24_s26 }
  0x16   :  { %s709_s29 = scalar_lea.hbm %s1021_s5, 1024 }
  0x17   :  { %p710_p8 = scmp.ne.s32.totalorder %s1021_s5, %s709_s29  ;;  %p713_p9 = scmp.lt.u32.totalorder %s709_s29, %s1021_s5 }
  0x19   :  { %p715_p10 = pnand %p713_p9, %p710_p8 }
  0x1b   :  { %718 = shalt.err (!%p715_p10)
}
  0x1c   :  { %s719_s1 = scalar_lea.vmem %s62_s24, 1024  ;;  %p724_p12 = scmp.lt.s32.totalorder %s62_s24, %s62_s24 }
  0x1d   :  { %p720_p11 = scmp.ne.s32.totalorder %s62_s24, %s719_s1  ;;  %p725_p13 = scmp.lt.s32.totalorder %s719_s1, %s719_s1 }
  0x1f   :  { %p726_p0 = por %p725_p13, %p724_p12 }
  0x21   :  { %p727_p1 = pnand %p726_p0, %p720_p11 }
  0x23   :  { %730 = shalt.err (!%p727_p1)
}
  0x24   :  { %67 = dma.hbm_to_vmem [thread:$0]  %s1021_s5, 1024, %s62_s24, [#allocation9], %s828_s19, %s828_s19, %s829_s20  }
  0x25   :  { %s731_s17 = scalar_lea.hbm %s1016_s0, 128 }
  0x26   :  { %p732_p2 = scmp.ne.s32.totalorder %s1016_s0, %s731_s17  ;;  %p735_p3 = scmp.lt.u32.totalorder %s731_s17, %s1016_s0 }
  0x28   :  { %p737_p4 = pnand %p735_p3, %p732_p2 }
  0x2a   :  { %740 = shalt.err (!%p737_p4)
}
  0x2b   :  { %s741_s25 = scalar_lea.vmem %s25_s26, 128  ;;  %p746_p6 = scmp.lt.s32.totalorder %s25_s26, %s25_s26 }
  0x2c   :  { %p742_p5 = scmp.ne.s32.totalorder %s25_s26, %s741_s25  ;;  %p747_p7 = scmp.lt.s32.totalorder %s741_s25, %s741_s25 }
  0x2e   :  { %p748_p8 = por %p747_p7, %p746_p6 }
  0x30   :  { %p749_p9 = pnand %p748_p8, %p742_p5 }
  0x32   :  { %752 = shalt.err (!%p749_p9)
}
  0x33   :  { %27 = dma.hbm_to_vmem [thread:$0]  %s1016_s0, 128, %s25_s26, [#allocation3]  }
  0x34   :  { %s832_s27 = smov [#allocation7]   ;;  %s833_s29 = smov [#allocation10]  }
  0x35   :  { %s47_s28 = sshll.u32 %s832_s27, 4  ;;  %s75_s30 = sshll.u32 %s833_s29, 4  ;;  %s48_s28 = int_to_ptr.vmem [resolvable:$true] %s47_s28  ;;  %s76_s30 = int_to_ptr.vmem [resolvable:$true] %s75_s30 }
  0x36   :  { %s753_s13 = scalar_lea.hbm %s1019_s3, 1024 }
  0x37   :  { %p754_p10 = scmp.ne.s32.totalorder %s1019_s3, %s753_s13  ;;  %p757_p11 = scmp.lt.u32.totalorder %s753_s13, %s1019_s3 }
  0x39   :  { %p759_p12 = pnand %p757_p11, %p754_p10 }
  0x3b   :  { %762 = shalt.err (!%p759_p12)
}
  0x3c   :  { %s763_s0 = scalar_lea.vmem %s48_s28, 1024  ;;  %p768_p0 = scmp.lt.s32.totalorder %s48_s28, %s48_s28 }
  0x3d   :  { %p764_p13 = scmp.ne.s32.totalorder %s48_s28, %s763_s0  ;;  %p769_p1 = scmp.lt.s32.totalorder %s763_s0, %s763_s0 }
  0x3f   :  { %p770_p2 = por %p769_p1, %p768_p0 }
  0x41   :  { %p771_p3 = pnand %p770_p2, %p764_p13 }
  0x43   :  { %774 = shalt.err (!%p771_p3)
}
  0x44   :  { %53 = dma.hbm_to_vmem [thread:$0]  %s1019_s3, 1024, %s48_s28, [#allocation6], %s828_s19, %s828_s19, %s829_s20  }
  0x45   :  { %s775_s21 = scalar_lea.hbm %s1023_s7, 1024 }
  0x46   :  { %p776_p4 = scmp.ne.s32.totalorder %s1023_s7, %s775_s21  ;;  %p779_p5 = scmp.lt.u32.totalorder %s775_s21, %s1023_s7 }
  0x48   :  { %p781_p6 = pnand %p779_p5, %p776_p4 }
  0x4a   :  { %784 = shalt.err (!%p781_p6)
}
  0x4b   :  { %s785_s24 = scalar_lea.vmem %s76_s30, 1024  ;;  %p790_p8 = scmp.lt.s32.totalorder %s76_s30, %s76_s30 }
  0x4c   :  { %p786_p7 = scmp.ne.s32.totalorder %s76_s30, %s785_s24  ;;  %p791_p9 = scmp.lt.s32.totalorder %s785_s24, %s785_s24 }
  0x4e   :  { %p792_p10 = por %p791_p9, %p790_p8 }
  0x50   :  { %p793_p11 = pnand %p792_p10, %p786_p7 }
  0x52   :  { %796 = shalt.err (!%p793_p11)
}
  0x53   :  { %81 = dma.hbm_to_vmem [thread:$0]  %s1023_s7, 1024, %s76_s30, [#allocation9], %s828_s19, %s828_s19, %s829_s20  }
  0x54   :  { %819 = dma.done.wait [#allocation3], 128  }
  0x55   :  { %820 = vsyncadd [#allocation3], 4294967168 }
  0x56   :  { %821 = dma.done.wait [#allocation6], 1152  }
  0x57   :  { %822 = vsyncadd [#allocation6], 4294966144 }
  0x58   :  { %823 = dma.done.wait [#allocation9], 2048  }
  0x59   :  { %824 = vsyncadd [#allocation9], 4294965248  ;;  %v834_v0 = vmov 0.0   ;;  %vm835_vm0 = vmmov 0   ;;  %v660_v1 = vld [vmem:[#allocation5] sm:$0xff]   ;;  %v100_v2 = vld [vmem:[#allocation2] sm:$0xff]  ;;  %v500_v52 = vlaneseq }
  0x5a   :  { %584 = vmatprep.subr.bf16.mxu0 %v834_v0  ;;  %586 = vmatprep.mubr.msk.bf16.mxu0 %vm835_vm0, %v834_v0  ;;  %v101_v3 = vpack.c.bf16 %v100_v2, %v100_v2  ;;  %vm117_vm1 = vcmask 130048   ;;  %v661_v4 = vld [vmem:[#allocation7] sm:$0xff]   ;;  %v662_v5 = vld [vmem:[#allocation7 + $0x8] sm:$0xff]   ;;  %v663_v6 = vld [vmem:[#allocation7 + $0x10] sm:$0xff]  }
  0x5b   :  { %590 = vmatprep.subr.bf16.mxu1 %v834_v0  ;;  %606 = vmatprep.mubr.msk.bf16.mxu1 %vm835_vm0, %v834_v0  ;;  %v664_v7 = vld [vmem:[#allocation7 + $0x18] sm:$0xff]   ;;  %v665_v8 = vld [vmem:[#allocation7 + $0x20] sm:$0xff]   ;;  %v666_v9 = vld [vmem:[#allocation7 + $0x28] sm:$0xff]   ;;  %v501_v53 = vand.u32 127, %v500_v52 }
  0x5c   :  { %585 = vmatpush3.bf16.msra.mxu0 %v660_v1  ;;  %591 = vmatpush3.bf16.msra.mxu1 %v661_v4  ;;  %v667_v10 = vld [vmem:[#allocation7 + $0x30] sm:$0xff]   ;;  %v668_v11 = vld [vmem:[#allocation7 + $0x38] sm:$0xff]   ;;  %v669_v12 = vld [vmem:[#allocation8] sm:$0xff]  }
  0x5d   :  { %610 = vmatprep.subr.bf16.mxu0 %v834_v0  ;;  %592 = vmatprep.subr.bf16.mxu1 %v834_v0  ;;  %v670_v13 = vld [vmem:[#allocation8 + $0x8] sm:$0xff]   ;;  %v671_v14 = vld [vmem:[#allocation8 + $0x10] sm:$0xff]   ;;  %v672_v15 = vld [vmem:[#allocation8 + $0x18] sm:$0xff]   ;;  %vm502_vm2 = vcmp.lt.s32.totalorder %v501_v53, 8 }
  0x5e   :  { %v673_v16 = vld [vmem:[#allocation8 + $0x20] sm:$0xff]   ;;  %v674_v17 = vld [vmem:[#allocation8 + $0x28] sm:$0xff]   ;;  %v525_v18 = vld [vmem:[%s1018_s2] ss:$0 sm:$0xff] }
  0x5f   :  { %587 = vmatmul.mubr.msk.bf16.vlgmr.msra.gmra.mrb[0].mxu0 %vm117_vm1, %v101_v3  ;;  %v675_v26 = vld [vmem:[#allocation8 + $0x30] sm:$0xff]   ;;  %v676_v27 = vld [vmem:[#allocation8 + $0x38] sm:$0xff]   ;;  %v677_v28 = vld [vmem:[#allocation10] sm:$0xff]  }
  0x60   :  { %626 = vmatprep.mubr.msk.bf16.mxu0 %vm835_vm0, %v834_v0  ;;  %593 = vmatpush3.bf16.msra.mxu1 %v662_v5  ;;  %v678_v29 = vld [vmem:[#allocation10 + $0x8] sm:$0xff]   ;;  %v679_v30 = vld [vmem:[#allocation10 + $0x10] sm:$0xff]   ;;  %v680_v31 = vld [vmem:[#allocation10 + $0x18] sm:$0xff]  }
  0x61   :  { %594 = vmatprep.subr.bf16.mxu1 %v834_v0  ;;  %611 = vmatpush3.bf16.msra.mxu0 %v669_v12  ;;  %v681_v32 = vld [vmem:[#allocation10 + $0x20] sm:$0xff]   ;;  %v682_v33 = vld [vmem:[#allocation10 + $0x28] sm:$0xff]   ;;  %v528_v34 = vld [vmem:[%s1020_s4] ss:$0 sm:$0xff] }
  0x62   :  { %612 = vmatprep.subr.bf16.mxu0 %v834_v0  ;;  %v683_v42 = vld [vmem:[#allocation10 + $0x30] sm:$0xff]   ;;  %v684_v43 = vld [vmem:[#allocation10 + $0x38] sm:$0xff]  }
  0x63   :  { %v537_v44 = vld [vmem:[%s1022_s6] ss:$0 sm:$0xff]  ;;  %s836_s6 = smov [#allocation11]  }
  0x64   :  { %595 = vmatpush3.bf16.msra.mxu1 %v663_v6  ;;  %v546_v54 = vld [vmem:[%s1024_s8] ss:$0 sm:$0xff]  ;;  %s514_s11 = sshll.u32 %s836_s6, 4  ;;  %s515_s11 = int_to_ptr.vmem [resolvable:$true] %s514_s11 }
  0x65   :  { %596 = vmatprep.subr.bf16.mxu1 %v834_v0  ;;  %613 = vmatpush3.bf16.msra.mxu0 %v670_v13  ;;  %s797_s12 = scalar_lea.vmem %s515_s11, 128  ;;  %p802_p13 = scmp.lt.s32.totalorder %s515_s11, %s515_s11 }
  0x66   :  { %614 = vmatprep.subr.bf16.mxu0 %v834_v0  ;;  %p798_p12 = scmp.ne.s32.totalorder %s515_s11, %s797_s12  ;;  %p803_p0 = scmp.lt.s32.totalorder %s797_s12, %s797_s12 }
  0x68   :  { %597 = vmatpush3.bf16.msra.mxu1 %v664_v7  ;;  %p804_p1 = por %p803_p0, %p802_p13 }
  0x69   :  { %598 = vmatprep.subr.bf16.mxu1 %v834_v0  ;;  %615 = vmatpush3.bf16.msra.mxu0 %v671_v14 }
  0x6a   :  { %616 = vmatprep.subr.bf16.mxu0 %v834_v0  ;;  %p805_p2 = pnand %p804_p1, %p798_p12 }
  0x6c   :  { %599 = vmatpush3.bf16.msra.mxu1 %v665_v8 }
  0x6d   :  { %600 = vmatprep.subr.bf16.mxu1 %v834_v0  ;;  %617 = vmatpush3.bf16.msra.mxu0 %v672_v15 }
  0x6e   :  { %618 = vmatprep.subr.bf16.mxu0 %v834_v0 }
  0x70   :  { %601 = vmatpush3.bf16.msra.mxu1 %v666_v9 }
  0x71   :  { %602 = vmatprep.subr.bf16.mxu1 %v834_v0  ;;  %619 = vmatpush3.bf16.msra.mxu0 %v673_v16 }
  0x72   :  { %620 = vmatprep.subr.bf16.mxu0 %v834_v0 }
  0x74   :  { %603 = vmatpush3.bf16.msra.mxu1 %v667_v10 }
  0x75   :  { %604 = vmatprep.subr.bf16.mxu1 %v834_v0  ;;  %621 = vmatpush3.bf16.msra.mxu0 %v674_v17 }
  0x76   :  { %622 = vmatprep.subr.bf16.mxu0 %v834_v0 }
  0x78   :  { %605 = vmatpush3.bf16.msra.mxu1 %v668_v11 }
  0x79   :  { %630 = vmatprep.subr.bf16.mxu1 %v834_v0  ;;  %623 = vmatpush3.bf16.msra.mxu0 %v675_v26 }
  0x7a   :  { %624 = vmatprep.subr.bf16.mxu0 %v834_v0 }
  0x7d   :  { %625 = vmatpush3.bf16.msra.mxu0 %v676_v27 }
 0x132   :  { %v155_v19 = vpop.f32.mrb[0].mxu0 }
 0x133   :  { %v156_v20 = vadd.f32 %v525_v18, %v155_v19  ;;  %v588_v21 = vpop.f32.mrb[1].mxu0 }
 0x134   :  { %v158_v22 = vpop.f32.mrb[2].mxu0 }
 0x135   :  { %v161_v23 = vmax.f32 %v156_v20, 0.0  ;;  %v589_v24 = vpop.f32.mrb[3].mxu0 }
 0x137   :  { %v162_v25 = vpack.c.bf16 %v161_v23, %v161_v23 }
 0x139   :  { %607 = vmatmul.mubr.bf16.vlgmr.msra.gmra.mrb[0].mxu1 %v162_v25 }
 0x13a   :  { %646 = vmatprep.mubr.msk.bf16.mxu1 %vm835_vm0, %v834_v0  ;;  %631 = vmatpush3.bf16.msra.mxu1 %v677_v28 }
 0x13b   :  { %632 = vmatprep.subr.bf16.mxu1 %v834_v0 }
 0x13e   :  { %633 = vmatpush3.bf16.msra.mxu1 %v678_v29 }
 0x13f   :  { %634 = vmatprep.subr.bf16.mxu1 %v834_v0 }
 0x142   :  { %635 = vmatpush3.bf16.msra.mxu1 %v679_v30 }
 0x143   :  { %636 = vmatprep.subr.bf16.mxu1 %v834_v0 }
 0x146   :  { %637 = vmatpush3.bf16.msra.mxu1 %v680_v31 }
 0x147   :  { %638 = vmatprep.subr.bf16.mxu1 %v834_v0 }
 0x14a   :  { %639 = vmatpush3.bf16.msra.mxu1 %v681_v32 }
 0x14b   :  { %640 = vmatprep.subr.bf16.mxu1 %v834_v0 }
 0x14e   :  { %641 = vmatpush3.bf16.msra.mxu1 %v682_v33 }
 0x14f   :  { %642 = vmatprep.subr.bf16.mxu1 %v834_v0 }
 0x152   :  { %643 = vmatpush3.bf16.msra.mxu1 %v683_v42 }
 0x153   :  { %644 = vmatprep.subr.bf16.mxu1 %v834_v0 }
 0x156   :  { %645 = vmatpush3.bf16.msra.mxu1 %v684_v43 }
 0x20c   :  { %v268_v35 = vpop.f32.mrb[0].mxu1 }
 0x20d   :  { %v269_v36 = vadd.f32 %v528_v34, %v268_v35  ;;  %v608_v37 = vpop.f32.mrb[1].mxu1 }
 0x20e   :  { %v271_v38 = vpop.f32.mrb[2].mxu1 }
 0x20f   :  { %v274_v39 = vmax.f32 %v269_v36, 0.0  ;;  %v609_v40 = vpop.f32.mrb[3].mxu1 }
 0x211   :  { %v275_v41 = vpack.c.bf16 %v274_v39, %v274_v39 }
 0x213   :  { %627 = vmatmul.mubr.bf16.vlgmr.msra.gmra.mrb[4].mxu0 %v275_v41 }
 0x2e6   :  { %v381_v45 = vpop.f32.mrb[4].mxu0 }
 0x2e7   :  { %v382_v46 = vadd.f32 %v537_v44, %v381_v45  ;;  %v628_v47 = vpop.f32.mrb[5].mxu0 }
 0x2e8   :  { %v384_v48 = vpop.f32.mrb[6].mxu0 }
 0x2e9   :  { %v387_v49 = vmax.f32 %v382_v46, 0.0  ;;  %v629_v50 = vpop.f32.mrb[7].mxu0 }
 0x2eb   :  { %v388_v51 = vpack.c.bf16 %v387_v49, %v387_v49 }
 0x2ed   :  { %647 = vmatmul.mubr.bf16.vlgmr.msra.gmra.mrb[4].mxu1 %v388_v51 }
 0x3c0   :  { %v494_v55 = vpop.f32.mrb[4].mxu1 }
 0x3c1   :  { %v495_v56 = vadd.f32 %v546_v54, %v494_v55  ;;  %v648_v57 = vpop.f32.mrb[5].mxu1 }
 0x3c2   :  { %v497_v58 = vpop.f32.mrb[6].mxu1 }
 0x3c3   :  { %v503_v59 = vsel %vm502_vm2, 0.0, %v495_v56  ;;  %v649_v60 = vpop.f32.mrb[7].mxu1 }
 0x3c4   :  { %v504_v61 = vmul.f32 1.442695, %v503_v59 }
 0x3c6   :  { %685 = vpow2.f32 %v504_v61 }
 0x3d0   :  { %v686_v62 = vpop.eup %685 }
 0x3d1   :  { %v506_v63 = vsel %vm502_vm2, %v495_v56, %v686_v62 }
 0x3d2   :  { %507 = vst [vmem:[#allocation11] sm:$0xff] %v506_v63 }
 0x3d3   :  { %808 = shalt.err (!%p805_p2)
}
 0x3d4   :  { %s809_s1 = scalar_lea.hbm %s1025_s9, 128 }
 0x3d5   :  { %p810_p3 = scmp.ne.s32.totalorder %s1025_s9, %s809_s1  ;;  %p813_p4 = scmp.lt.u32.totalorder %s809_s1, %s1025_s9 }
 0x3d7   :  { %p815_p5 = pnand %p813_p4, %p810_p3 }
 0x3d9   :  { %818 = shalt.err (!%p815_p5)
}
 0x3da   :  { %517 = dma.vmem_to_hbm [thread:$0]  %s515_s11, 128, %s1025_s9, [#allocation4]  }
 0x3db   :  { %825 = dma.done.wait [#allocation4], 128  }
 0x3dc   :  { %826 = vsyncadd [#allocation4], 4294967168 }
 0x3dd   :  { %521 = vsyncpa [#allocation3], 1 }
 0x3de   :  { %522 = vsyncpa [#allocation6], 1 }
 0x3df   :  { %523 = vsyncpa [#allocation9], 1 }
 0x3e0   :  { %524 = vsyncpa [#allocation4], 1 }

</bundles_post_ra>
